<compile_context>
chip_gen: v6e
topology: v6e:2x2x1
jax: 0.10.0
libtpu: 0.0.40
codegen_flags: <defaults>
</compile_context>

<pallas_src>
import numpy as np
import jax
import jax.numpy as jnp
from jax.experimental import pallas as pl
from jax.experimental.pallas import tpu as pltpu


def _pick_tile(dim, candidates):
    for c in candidates:
        if dim % c == 0:
            return c
    return dim


def _scatter_constants(gw, dtype):
    """Block-diagonal 0/1 scatter constants for ONE group of `gw` luma columns.

    sy    : (gw, 3*gw)  y[w]            -> out lane 3*w             (channel 0)
    scbcr : (gw, 3*gw)  rows [0, gw/2)  : cb[j] -> lanes 6j+1, 6j+4 (channel 1)
                        rows [gw/2, gw) : cr[j] -> lanes 6j+2, 6j+5 (channel 2)
    Every output lane gets exactly one nonzero (1.0) coefficient.
    """
    w = np.arange(gw)
    sy = np.zeros((gw, 3 * gw), np.float32)
    sy[w, 3 * w] = 1.0

    hw = gw // 2
    j = np.arange(hw)
    scbcr = np.zeros((gw, 3 * gw), np.float32)
    scbcr[j, 6 * j + 1] = 1.0
    scbcr[j, 6 * j + 4] = 1.0
    scbcr[hw + j, 6 * j + 2] = 1.0
    scbcr[hw + j, 6 * j + 5] = 1.0
    return jnp.asarray(sy, dtype), jnp.asarray(scbcr, dtype)


def _chroma_upsampling_kernel(y_ref, cb_ref, cr_ref, sy_ref, scbcr_ref, out_ref):
    gw = sy_ref.shape[0]          # luma columns per scatter group
    hw = gw // 2                  # chroma columns per group
    tw = y_ref.shape[-1]          # luma columns in this tile
    n_groups = tw // gw
    mxu_dtype = sy_ref.dtype

    sy = sy_ref[...]              # (gw, 3*gw), constant, fetched once
    scbcr = scbcr_ref[...]        # (gw, 3*gw)

    # Static (unrolled) loop over 128-lane scatter groups.
    for g in range(n_groups):
        y_g = y_ref[:, g * gw:(g + 1) * gw].astype(mxu_dtype)      # (th, gw)
        cb_g = cb_ref[:, g * hw:(g + 1) * hw].astype(mxu_dtype)    # (th/2, gw/2)
        cr_g = cr_ref[:, g * hw:(g + 1) * hw].astype(mxu_dtype)    # (th/2, gw/2)
        cbcr_g = jnp.concatenate([cb_g, cr_g], axis=-1)            # (th/2, gw)

        # Channel scatter (+ chroma width 2x) on the MXU: each output lane
        # receives exactly one 1.0*x product -> exact.
        y_scat = jnp.dot(y_g, sy, preferred_element_type=jnp.float32)       # (th, 3gw)
        c_scat = jnp.dot(cbcr_g, scbcr, preferred_element_type=jnp.float32)  # (th/2, 3gw)

        # Chroma height 2x: sublane duplication (XLU), not a matmul.
        c_up = jnp.repeat(c_scat, 2, axis=0)                       # (th, 3gw)

        # y and chroma occupy disjoint lanes, so the add is exact.
        out_ref[:, g * 3 * gw:(g + 1) * 3 * gw] = (y_scat + c_up).astype(out_ref.dtype)


def chroma_upsampling(y, cb, cr, *, use_bf16_mxu=True):
    """y: (B, H, W), cb/cr: (B, H/2, W/2)  ->  (B, H, W, 3)."""
    B, H, W = y.shape
    assert H % 2 == 0 and W % 2 == 0, "even spatial dims required (4:2:0 chroma)"
    assert cb.shape == (B, H // 2, W // 2) and cr.shape == (B, H // 2, W // 2)

    dtype = y.dtype
    bpe = np.dtype(dtype).itemsize

    # Width tile: multiple of 256 preferred (chroma block lane dim 128-aligned);
    # otherwise fall back to full W (blocks equal to full dims are always legal,
    # and the scatter constants are group-sized, so they no longer scale with W).
    tw = _pick_tile(W, (512, 256))
    # Scatter group width: 128 luma lanes when possible, else the whole tile.
    gw = 128 if tw % 128 == 0 else tw

    # Row tile: as large as possible to amortize per-step pipeline overhead,
    # then clamped so the double-buffered pipeline working set stays modest
    # (important when tw fell back to a large full-W value, and on v7x's
    # smaller VMEM).
    th = _pick_tile(H, (512, 256, 128, 64, 32, 16))
    def _step_bytes(th_):
        return (th_ * tw + 2 * (th_ // 2) * (tw // 2) + th_ * 3 * tw) * bpe
    while (th > 16 and th % 2 == 0 and H % (th // 2) == 0
           and 2 * _step_bytes(th) > 8 * 1024 * 1024):
        th //= 2

    # bf16 constants/operands are exact for JPEG pixel values (0..255 integers);
    # use_bf16_mxu=False keeps full f32 matmuls for arbitrary float32 inputs.
    mxu_dtype = jnp.bfloat16 if use_bf16_mxu else jnp.float32
    sy, scbcr = _scatter_constants(gw, mxu_dtype)

    out3 = pl.pallas_call(
        _chroma_upsampling_kernel,
        out_shape=jax.ShapeDtypeStruct((B, H, 3 * W), dtype),
        grid=(B, H // th, W // tw),
        in_specs=[
            pl.BlockSpec((pl.Squeezed(), th, tw), lambda b, i, j: (b, i, j)),
            pl.BlockSpec((pl.Squeezed(), th // 2, tw // 2), lambda b, i, j: (b, i, j)),
            pl.BlockSpec((pl.Squeezed(), th // 2, tw // 2), lambda b, i, j: (b, i, j)),
            # Constant scatter matrices: block index never changes, so the
            # pipeline fetches them only once.
            pl.BlockSpec((gw, 3 * gw), lambda b, i, j: (0, 0)),
            pl.BlockSpec((gw, 3 * gw), lambda b, i, j: (0, 0)),
        ],
        out_specs=pl.BlockSpec((pl.Squeezed(), th, 3 * tw), lambda b, i, j: (b, i, j)),
        compiler_params=pltpu.CompilerParams(
            dimension_semantics=("parallel", "parallel", "parallel"),
            vmem_limit_bytes=32 * 1024 * 1024),
    )(y, cb, cr, sy, scbcr)

    # (B, H, 3W) has the same contiguous layout as (B, H, W, 3): free reshape.
    return out3.reshape(B, H, W, 3)


if __name__ == "__main__":
    def run_check(B, H, W, key):
        ky, kcb, kcr = jax.random.split(key, 3)
        # Pixel-like integer-valued floats, as in a JPEG pipeline.
        y = jax.random.randint(ky, (B, H, W), 0, 256).astype(jnp.float32)
        cb = jax.random.randint(kcb, (B, H // 2, W // 2), 0, 256).astype(jnp.float32)
        cr = jax.random.randint(kcr, (B, H // 2, W // 2), 0, 256).astype(jnp.float32)

        out = jax.block_until_ready(chroma_upsampling(y, cb, cr))
        assert out.shape == (B, H, W, 3)

        # Reference (same semantics as the PyTorch forward).
        cb_up = jnp.repeat(jnp.repeat(cb, 2, axis=1), 2, axis=2)
        cr_up = jnp.repeat(jnp.repeat(cr, 2, axis=1), 2, axis=2)
        ref = jnp.stack([y, cb_up, cr_up], axis=-1)
        np.testing.assert_allclose(np.asarray(out), np.asarray(ref), rtol=0, atol=1e-5)

    k1, k2 = jax.random.split(jax.random.PRNGKey(0))
    run_check(2, 16, 16, k1)    # small-shape path: single group, full-dim blocks
    run_check(2, 16, 256, k2)   # main path: 128-lane scatter groups, aligned blocks
    print("KERNEL_OK")
</pallas_src>

<mosaic_0001>
module attributes {stable_mosaic.version = 11 : i64} {
  func.func @_chroma_upsampling_kernel(%arg0: i32, %arg1: i32, %arg2: i32, %arg3: memref<1x16x16xf32, #tpu.memory_space<vmem>>, %arg4: memref<1x8x8xf32, #tpu.memory_space<vmem>>, %arg5: memref<1x8x8xf32, #tpu.memory_space<vmem>>, %arg6: memref<16x48xbf16, #tpu.memory_space<vmem>>, %arg7: memref<16x48xbf16, #tpu.memory_space<vmem>>, %arg8: memref<1x16x48xf32, #tpu.memory_space<vmem>>) attributes {dimension_semantics = [#tpu.dimension_semantics<parallel>, #tpu.dimension_semantics<parallel>, #tpu.dimension_semantics<parallel>], iteration_bounds = array<i64: 2, 1, 1>, scalar_prefetch = 0 : i64, scratch_operands = 0 : i64, tpu.core_type = #tpu.core_type<tc>, window_params = [{transform_indices = @transform_0, window_bounds = array<i64: 1, 16, 16>}, {transform_indices = @transform_1, window_bounds = array<i64: 1, 8, 8>}, {transform_indices = @transform_2, window_bounds = array<i64: 1, 8, 8>}, {pipeline_mode = #tpu.pipeline_mode<synchronous>, transform_indices = @transform_3, window_bounds = array<i64: 16, 48>}, {pipeline_mode = #tpu.pipeline_mode<synchronous>, transform_indices = @transform_4, window_bounds = array<i64: 16, 48>}, {transform_indices = @transform_5, window_bounds = array<i64: 1, 16, 48>}]} {
    %c0 = arith.constant 0 : index
    %c0_0 = arith.constant 0 : index
    %0 = vector.load %arg6[%c0, %c0_0] : memref<16x48xbf16, #tpu.memory_space<vmem>>, vector<16x48xbf16>
    %c0_1 = arith.constant 0 : index
    %c0_2 = arith.constant 0 : index
    %1 = vector.load %arg7[%c0_1, %c0_2] : memref<16x48xbf16, #tpu.memory_space<vmem>>, vector<16x48xbf16>
    %c0_3 = arith.constant 0 : index
    %c0_4 = arith.constant 0 : index
    %c0_5 = arith.constant 0 : index
    %2 = vector.load %arg3[%c0_3, %c0_4, %c0_5] : memref<1x16x16xf32, #tpu.memory_space<vmem>>, vector<1x16x16xf32>
    %3 = vector.shape_cast %2 : vector<1x16x16xf32> to vector<16x16xf32>
    %4 = arith.truncf %3 : vector<16x16xf32> to vector<16x16xbf16>
    %c0_6 = arith.constant 0 : index
    %c0_7 = arith.constant 0 : index
    %c0_8 = arith.constant 0 : index
    %5 = vector.load %arg4[%c0_6, %c0_7, %c0_8] : memref<1x8x8xf32, #tpu.memory_space<vmem>>, vector<1x8x8xf32>
    %6 = vector.shape_cast %5 : vector<1x8x8xf32> to vector<8x8xf32>
    %7 = arith.truncf %6 : vector<8x8xf32> to vector<8x8xbf16>
    %c0_9 = arith.constant 0 : index
    %c0_10 = arith.constant 0 : index
    %c0_11 = arith.constant 0 : index
    %8 = vector.load %arg5[%c0_9, %c0_10, %c0_11] : memref<1x8x8xf32, #tpu.memory_space<vmem>>, vector<1x8x8xf32>
    %9 = vector.shape_cast %8 : vector<1x8x8xf32> to vector<8x8xf32>
    %10 = arith.truncf %9 : vector<8x8xf32> to vector<8x8xbf16>
    %11 = tpu.concatenate %7, %10 in 1 : vector<8x8xbf16>, vector<8x8xbf16> -> vector<8x16xbf16>
    %cst = arith.constant dense<0.000000e+00> : vector<16x48xf32>
    %12 = tpu.matmul %4, %0, %cst {dimension_numbers = #tpu.dot_dimension_numbers<[1], [0], [0], [1], [0, 0, 1, 1], [], []>} : vector<16x16xbf16>, vector<16x48xbf16>, vector<16x48xf32> -> vector<16x48xf32>
    %cst_12 = arith.constant dense<0.000000e+00> : vector<8x48xf32>
    %13 = tpu.matmul %11, %1, %cst_12 {dimension_numbers = #tpu.dot_dimension_numbers<[1], [0], [0], [1], [0, 0, 1, 1], [], []>} : vector<8x16xbf16>, vector<16x48xbf16>, vector<8x48xf32> -> vector<8x48xf32>
    %14 = vector.shape_cast %13 : vector<8x48xf32> to vector<8x1x48xf32>
    %15 = vector.broadcast %14 : vector<8x1x48xf32> to vector<8x2x48xf32>
    %16 = vector.shape_cast %15 : vector<8x2x48xf32> to vector<16x48xf32>
    %17 = arith.addf %12, %16 : vector<16x48xf32>
    %c0_13 = arith.constant 0 : index
    %c0_14 = arith.constant 0 : index
    %c0_15 = arith.constant 0 : index
    %18 = vector.load %arg8[%c0_13, %c0_14, %c0_15] : memref<1x16x48xf32, #tpu.memory_space<vmem>>, vector<1x16x48xf32>
    %19 = vector.shape_cast %18 : vector<1x16x48xf32> to vector<16x48xf32>
    %20 = vector.shape_cast %17 : vector<16x48xf32> to vector<1x16x48xf32>
    tpu.vector_store %arg8[%c0_13, %c0_14, %c0_15], %20 {strides = array<i32>} : memref<1x16x48xf32, #tpu.memory_space<vmem>>, vector<1x16x48xf32>,
    return
  }
  func.func @transform_0(%arg0: i32, %arg1: i32, %arg2: i32) -> (i32, i32, i32) {
    %c0_i32 = arith.constant 0 : i32
    return %arg0, %arg1, %arg2 : i32, i32, i32
  }
  func.func @transform_1(%arg0: i32, %arg1: i32, %arg2: i32) -> (i32, i32, i32) {
    %c0_i32 = arith.constant 0 : i32
    return %arg0, %arg1, %arg2 : i32, i32, i32
  }
  func.func @transform_2(%arg0: i32, %arg1: i32, %arg2: i32) -> (i32, i32, i32) {
    %c0_i32 = arith.constant 0 : i32
    return %arg0, %arg1, %arg2 : i32, i32, i32
  }
  func.func @transform_3(%arg0: i32, %arg1: i32, %arg2: i32) -> (i32, i32) {
    %c0_i32 = arith.constant 0 : i32
    %c0_i32_0 = arith.constant 0 : i32
    %c0_i32_1 = arith.constant 0 : i32
    return %c0_i32, %c0_i32_0 : i32, i32
  }
  func.func @transform_4(%arg0: i32, %arg1: i32, %arg2: i32) -> (i32, i32) {
    %c0_i32 = arith.constant 0 : i32
    %c0_i32_0 = arith.constant 0 : i32
    %c0_i32_1 = arith.constant 0 : i32
    return %c0_i32, %c0_i32_0 : i32, i32
  }
  func.func @transform_5(%arg0: i32, %arg1: i32, %arg2: i32) -> (i32, i32, i32) {
    %c0_i32 = arith.constant 0 : i32
    return %arg0, %arg1, %arg2 : i32, i32, i32
  }
}

</mosaic_0001>

<bundles_post_ra>
// kernel: tpu_custom_call.1
= control target key start
LH: loop header
LB: loop body
LE: loop exit
PB: predicated region body
PF: predicated region fallthrough
CT: control target
= control target key end

     0   :  { %s1462_s0 = inlined_call_operand.hbm [shape: f32[2,16,16], index: 0, kind: input, shape index: {}]   ;;  %s1463_s1 = inlined_call_operand.hbm [shape: f32[2,8,8], index: 1, kind: input, shape index: {}]   ;;  %s1464_s2 = inlined_call_operand.hbm [shape: f32[2,8,8], index: 2, kind: input, shape index: {}]   ;;  %s1465_s3 = inlined_call_operand.hbm [shape: bf16[16,48], index: 3, kind: input, shape index: {}]   ;;  %s1466_s4 = inlined_call_operand.hbm [shape: bf16[16,48], index: 4, kind: input, shape index: {}]   ;;  %s1467_s5 = inlined_call_operand.hbm [shape: f32[2,16,48], index: 5, kind: output, shape index: {}]  }
   0x1   :  { %1478 = sst [smem:[#allocation20_spill]] %s1463_s1 }
   0x2   :  { %1479 = sst [smem:[#allocation21_spill]] %s1464_s2 }
   0x3   :  { %1480 = sst [smem:[#allocation22_spill]] %s1465_s3 }
   0x4   :  { %10 = vsyncpa [#allocation3], 0 }
   0x5   :  { %12 = vsyncpa [#allocation3 + $0x1], 0 }
   0x6   :  { %13 = vsyncpa [#allocation6], 0 }
   0x7   :  { %15 = vsyncpa [#allocation6 + $0x1], 0 }
   0x8   :  { %16 = vsyncpa [#allocation9], 0 }
   0x9   :  { %17 = vsyncpa [#allocation4], 0 }
   0xa   :  { %19 = vsyncpa [#allocation4 + $0x1], 0  ;;  %s1225_s18 = smov 0   ;;  %s1227_s19 = smov 0  }
   0xb   :  { %s1229_s20 = smov 0   ;;  %s1231_s21 = smov 0  }
   0xc   :  { %s1233_s22 = smov 0   ;;  %s1235_s23 = smov 0  }
   0xd LB: > { %1481 = sst [smem:[#allocation16_spill]] %s1157_s18  ;;  %s1256_s24 = sadd.s32 4294967295, %s1177_s23   ;;  %s1177_s23 = sphi %s1235_s23, %s25_s23   ;;  %s1173_s22 = sphi %s1233_s22, %s1514_s22   ;;  %s1169_s21 = sphi %s1231_s21, %s1513_s21   ;;  %s1165_s20 = sphi %s1229_s20, %s1512_s20   ;;  %s1161_s19 = sphi %s1227_s19, %s1511_s19   ;;  %s1157_s18 = sphi %s1225_s18, %s1510_s18  }
   0xe   : > { %s802_s25 = sadd.s32 4294967294, %s1177_s23   ;;  %p68_p0 = scmp.ne.s32.totalorder %s1161_s19, %s1157_s18 }
   0xf   : > { %p1468_p1 = scmp.eq.s32.totalorder %s1256_s24, 0  ;;  %p204_p3 = scmp.eq.s32.totalorder %s802_s25, 1 }
  0x10   : > { %p803_p5 = scmp.ge.s32.totalorder %s1177_s23, 1  ;;  %p211_p7 = scmp.lt.s32.totalorder %s1177_s23, 3 }
  0x11   : > { %p1265_p4 = por %p1468_p1, %p68_p0  ;;  %p1270_p6 = por %p204_p3, %p68_p0 }
  0x12   : > { %p1275_p8 = pnand %p803_p5, %p211_p7  ;;  %s1179_s29 = smov [#allocation8]  }
  0x13   : > { %s1483_s27 = scalar_select %p1270_p6, 1, 0 }
  0x14   : > { %s223_s30 = sshll.u32 %s1179_s29, 4  ;;  %p864_p9 = pneg %p1275_p8  ;;  %s224_s30 = int_to_ptr.vmem [resolvable:$true] %s223_s30 }
  0x15   : > { %1484 = sst [smem:[#allocation17_spill]] %s1483_s27  ;;  %s44_s7 = sadd.s32 1, %s1173_s22 }
  0x16   : > { %p1284_p11 = pnand %p864_p9, %p1468_p1  ;;  %s964_s8 = scalar_lea.vmem %s224_s30, 128 }
  0x17   : > { %p965_p13 = scmp.ne.s32.totalorder %s224_s30, %s964_s8  ;;  %p972_p5 = scmp.lt.s32.totalorder %s224_s30, %s224_s30 }
  0x18   : > { %p1474_p12 = pneg %p1284_p11  ;;  %p973_p7 = scmp.lt.s32.totalorder %s964_s8, %s964_s8 }
  0x1a   : > { %p967_p0 = pnand %p965_p13, %p1474_p12  ;;  %p974_p2 = por %p973_p7, %p972_p5 }
  0x1c   : > { %p968_p3 = pneg %p967_p0 }
  0x1e   : > { %p975_p10 = pnand %p974_p2, %p968_p3 }
  0x20   : > { %978 = shalt.err (!%p975_p10)
}
  0x21   : > { %s1469_s9 = smov 64   ;;  %s1470_s10 = smov 4  }
  0x22   : > { %s1487_s3 = sld [smem:[#allocation22_spill]]  ;;  %p46_p2 = scmp.ge.s32.totalorder %s44_s7, 2 }
  0x23   : > { %s55_s13 = sadd.s32 1, %s1165_s20  ;;  %p62_p9 = scmp.ne.s32.totalorder %s1165_s20, %s1161_s19 }
  0x24   : > { %p63_p10 = scmp.eq.s32.totalorder %s1177_s23, 0  ;;  %s1516_s7 = smov (%p46_p2, %s44_s7), 0 }
  0x25   : > { %1488 = sst [smem:[#allocation18_spill]] %s1516_s7  ;;  %p1489_p0 = scmp.eq.s32.totalorder %s1256_s24, 1 }
  0x26   : > { %p64_p13 = por %p63_p10, %p62_p9  ;;  %s48_s15 = ssub.s32 %s1173_s22, %s1516_s7 }
  0x27   : > { %p1310_p3 = por %p1489_p0, %p62_p9  ;;  %p887_p5 = scmp.lt.s32.totalorder %s1177_s23, 2 }
  0x28   : > { %867 = dma.hbm_to_vmem [thread:$0]  (!%p1284_p11), %s1487_s3, 128, %s224_s30, [#allocation9], %s1469_s9, %s1469_s9, %s1470_s10  }
  0x29   : > { %s1490_s14 = scalar_select %p1310_p3, 1, 0 }
  0x2a   : > { %p53_p7 = scmp.eq.s32.totalorder %s48_s15, 0  ;;  %s1318_s16 = sand.u32 1, %s1165_s20  }
  0x2b   : > { %p1320_p1 = pnand %p887_p5, %p64_p13  ;;  %s274_s25 = sand.u32 1, %s1177_s23  }
  0x2c   : > { %s1326_s29 = scalar_select %p53_p7, %s1165_s20, %s55_s13  }
  0x2d   : > { %s1477_s30 = sshll.u32 %s1318_s16, 3  ;;  %s811_s8 = sshll.u32 %s1173_s22, 7 }
  0x2e   : > { %1492 = sst [smem:[#allocation19_spill]] %s1326_s29  ;;  %s278_s15 = scalar_lea.vmem [#allocation5], %s1477_s30 }
  0x2f   : > { %s1493_s1 = sld [smem:[#allocation20_spill]]  ;;  %s287_s10 = sshll.u32 %s278_s15, 4  ;;  %s288_s10 = int_to_ptr.vmem [resolvable:$true] %s287_s10 }
  0x30   : > { %s1494_s2 = sld [smem:[#allocation21_spill]]  ;;  %s1340_s18 = scalar_lea.sflag [#allocation6], %s274_s25 }
  0x31   : > { %p1475_p2 = pneg %p1320_p1  ;;  %s992_s13 = scalar_lea.vmem %s288_s10, 128 }
  0x32   : > { %p993_p9 = scmp.ne.s32.totalorder %s288_s10, %s992_s13  ;;  %s1182_s11 = smov [#allocation5]  }
  0x33   : > { %s997_s12 = sshll.u32 %s1182_s11, 4  ;;  %s998_s12 = int_to_ptr.vmem [resolvable:$false] %s997_s12 }
  0x34   : > { %p995_p10 = pnand %p993_p9, %p1475_p2  ;;  %s999_s15 = scalar_lea.vmem %s998_s12, 256 }
  0x35   : > { %s285_s9 = scalar_lea.hbm %s1493_s1, %s811_s8  ;;  %p1000_p0 = scmp.lt.s32.totalorder %s288_s10, %s998_s12 }
  0x36   : > { %s1338_s27 = scalar_lea.hbm %s1494_s2, %s811_s8  ;;  %p996_p13 = pneg %p995_p10 }
  0x37   : > { %p1001_p5 = scmp.lt.s32.totalorder %s999_s15, %s992_s13 }
  0x39   : > { %p1002_p7 = por %p1001_p5, %p1000_p0 }
  0x3b   : > { %p1003_p12 = pnand %p1002_p7, %p996_p13 }
  0x3d   : > { %1006 = shalt.err (!%p1003_p12)
}
  0x3e   : > { %877 = dma.hbm_to_vmem [thread:$0]  (!%p1320_p1), %s285_s9, 128, %s288_s10, %s1340_s18  }
  0x3f   : > { %s1183_s3 = smov [#allocation10]   ;;  %s807_s25 = sshll.u32 %s1318_s16, 4 }
  0x40   : > { %s236_s7 = sshll.u32 %s1183_s3, 4  ;;  %p1495_p10 = pneg %p1284_p11  ;;  %s237_s7 = int_to_ptr.vmem [resolvable:$true] %s236_s7 }
  0x41   : > { %s1018_s8 = scalar_lea.vmem %s237_s7, 128  ;;  %p1026_p3 = scmp.lt.s32.totalorder %s237_s7, %s237_s7 }
  0x42   : > { %p1019_p9 = scmp.ne.s32.totalorder %s237_s7, %s1018_s8  ;;  %p1027_p0 = scmp.lt.s32.totalorder %s1018_s8, %s1018_s8 }
  0x44   : > { %p1021_p2 = pnand %p1019_p9, %p1495_p10  ;;  %p1028_p13 = por %p1027_p0, %p1026_p3 }
  0x46   : > { %p1022_p6 = pneg %p1021_p2 }
  0x48   : > { %p1029_p12 = pnand %p1028_p13, %p1022_p6 }
  0x4a   : > { %1032 = shalt.err (!%p1029_p12)
}
  0x4b   : > { %s1496_s13 = smov 4   ;;  %s1497_s11 = smov 64  }
  0x4c   : > { %870 = dma.hbm_to_vmem [thread:$0]  (!%p1284_p11), %s1466_s4, 128, %s237_s7, [#allocation9], %s1497_s11, %s1497_s11, %s1496_s13  }
  0x4d   : > { %s830_s12 = sshll.u32 %s1173_s22, 8  ;;  %s254_s15 = scalar_lea.vmem [#allocation2], %s807_s25 }
  0x4e   : > { %s264_s3 = sshll.u32 %s254_s15, 4  ;;  %s263_s1 = scalar_lea.hbm %s1462_s0, %s830_s12  ;;  %s265_s3 = int_to_ptr.vmem [resolvable:$true] %s264_s3 }
  0x4f   : > { %s251_s2 = scalar_lea.sflag [#allocation3], %s1318_s16  ;;  %s1046_s6 = scalar_lea.vmem %s265_s3, 256 }
  0x50   : > { %p1047_p6 = scmp.ne.s32.totalorder %s265_s3, %s1046_s6  ;;  %p1498_p3 = pneg %p1320_p1 }
  0x51   : > { %s1184_s9 = smov [#allocation2]  }
  0x52   : > { %p1049_p2 = pnand %p1047_p6, %p1498_p3  ;;  %s1051_s10 = sshll.u32 %s1184_s9, 4  ;;  %s1052_s10 = int_to_ptr.vmem [resolvable:$false] %s1051_s10 }
  0x53   : > { %s1053_s29 = scalar_lea.vmem %s1052_s10, 512  ;;  %p1054_p11 = scmp.lt.s32.totalorder %s265_s3, %s1052_s10 }
  0x54   : > { %p1050_p5 = pneg %p1049_p2  ;;  %p1055_p7 = scmp.lt.s32.totalorder %s1053_s29, %s1046_s6 }
  0x56   : > { %p1056_p9 = por %p1055_p7, %p1054_p11 }
  0x58   : > { %p1057_p10 = pnand %p1056_p9, %p1050_p5 }
  0x5a   : > { %1060 = shalt.err (!%p1057_p10)
}
  0x5b   : > { %s1185_s7 = smov 128   ;;  %s1186_s30 = smov 8  }
  0x5c   : > { %874 = dma.hbm_to_vmem [thread:$0]  (!%p1320_p1), %s263_s1, 256, %s265_s3, %s251_s2, %s1185_s7, %s1185_s7, %s1186_s30  }
  0x5d   : > { %s1499_s25 = sshll.u32 %s1318_s16, 3  ;;  %p1500_p13 = pmov %p1498_p3 }
  0x5e   : > { %s298_s13 = scalar_lea.vmem [#allocation7], %s1499_s25  ;;  %s1187_s29 = smov [#allocation7]  }
  0x5f   : > { %s307_s11 = sshll.u32 %s298_s13, 4  ;;  %s1079_s15 = sshll.u32 %s1187_s29, 4  ;;  %s308_s11 = int_to_ptr.vmem [resolvable:$true] %s307_s11  ;;  %s1080_s15 = int_to_ptr.vmem [resolvable:$false] %s1079_s15 }
  0x60   : > { %s1074_s12 = scalar_lea.vmem %s308_s11, 128  ;;  %s1081_s8 = scalar_lea.vmem %s1080_s15, 256 }
  0x61   : > { %p1075_p0 = scmp.ne.s32.totalorder %s308_s11, %s1074_s12  ;;  %p1082_p3 = scmp.lt.s32.totalorder %s308_s11, %s1080_s15 }
  0x62   : > { %p1083_p2 = scmp.lt.s32.totalorder %s1081_s8, %s1074_s12 }
  0x63   : > { %p1077_p12 = pnand %p1075_p0, %p1500_p13 }
  0x64   : > { %p1084_p5 = por %p1083_p2, %p1082_p3 }
  0x65   : > { %p1078_p6 = pneg %p1077_p12 }
  0x67   : > { %p1085_p11 = pnand %p1084_p5, %p1078_p6 }
  0x69   : > { %1088 = shalt.err (!%p1085_p11)
}
  0x6a   : > { %880 = dma.hbm_to_vmem [thread:$0]  (!%p1320_p1), %s1338_s27, 128, %s308_s11, %s1340_s18  }
  0x6b   : > { %316 = sbr.rel (%p1275_p8) target bundleno = 465 (0x1d1), region = 40  ;;  %s1384_s1 = sand.u32 (!%p1275_p8), 1, %s1161_s19  }
  0x6c   : > { %s815_s2 = sshll.u32 (!%p1275_p8), %s1384_s1, 4  ;;  %s319_s16 = scalar_lea.sflag (!%p1275_p8), [#allocation3], %s1384_s1 }
  0x6d   : > { %s322_s3 = scalar_lea.vmem (!%p1275_p8), [#allocation2], %s815_s2 }
  0x70   : > { %1140 = dma.done.wait (%p1265_p4), %s319_s16, 256  }
  0x71   : > { %1142 = vsyncadd (%p1265_p4), %s319_s16, 4294967040  ;;  %s327_s18 = sand.u32 1, %s1256_s24   ;;  %s816_s27 = sshll.u32 %s1384_s1, 3 }
  0x72   : > { %s328_s28 = scalar_lea.sflag [#allocation6], %s327_s18  ;;  %s331_s17 = scalar_lea.vmem [#allocation5], %s816_s27 }
  0x73   : > { %1144 = dma.done.wait (%p1265_p4), %s328_s28, 256  }
  0x74   : > { %1146 = vsyncadd (%p1265_p4), %s328_s28, 4294967040  ;;  %s340_s6 = scalar_lea.vmem [#allocation7], %s816_s27  ;;  %p1501_p1 = scmp.eq.s32.totalorder %s1256_s24, 0 }
  0x76   : > { %1148 = dma.done.wait (%p1501_p1), [#allocation9], 256   ;;  %p1502_p8 = pmov %p1501_p1 }
  0x77   : > { %v1188_v0 = vmov 0.0   ;;  %vm1189_vm0 = vmmov 0   ;;  %v397_v1 = vld [vmem:[%s340_s6] sm:$0xff]  ;;  %v951_v3 = vld [vmem:[#allocation10] sm:$0xff]   ;;  %v952_v4 = vld [vmem:[#allocation8] sm:$0xff]   ;;  %s1190_s26 = smov 8   ;;  %v460_v18 = vlaneseq }
  0x78   : > { %1150 = vsyncadd (%p1502_p8), [#allocation9], 4294967040  ;;  %836 = vmatprep.subr.bf16.mxu0 %v1188_v0  ;;  %838 = vmatprep.mubr.msk.bf16.mxu0 %vm1189_vm0, %v1188_v0  ;;  %v398_v2 = vpack.c.bf16 %v397_v1, %v397_v1  ;;  %v392_v5 = vld [vmem:[%s322_s3] sm:$0xff]  ;;  %v393_v6 = vld [vmem:[%s322_s3 + $0x8] sm:$0xff]  ;;  %vm412_vm1 = vcmask 130048   ;;  %vm402_vm2 = vcmask 64512  }
  0x79   : > { %842 = vmatprep.subr.bf16.mxu1 %v1188_v0  ;;  %844 = vmatprep.mubr.msk.bf16.mxu1 %vm1189_vm0, %v1188_v0  ;;  %v394_v7 = vpack.c.bf16 %v393_v6, %v392_v5  ;;  %v395_v8 = vld [vmem:[%s331_s17] sm:$0xff]  ;;  %v1191_v16 = vmov 1966171168   ;;  %v461_v20 = vshrl.u32 %v460_v18, 7  ;;  %v1192_v23 = vmov 1983009808  }
  0x7a   : > { %400 = vrot.lane.b32.xlu0 %v398_v2, %s1190_s26  ;;  %837 = vmatpush3.bf16.msra.mxu0 %v951_v3  ;;  %v396_v9 = vpack.c.bf16 %v395_v8, %v395_v8  ;;  %v458_v17 = vunpack.c.l.s4 %v1191_v16  ;;  %v546_v24 = vunpack.c.l.s4 %v1192_v23  ;;  %s384_s24 = scalar_lea.vmem [#allocation11], %s815_s2  ;;  %vm623_vm3 = vcmask 392192   ;;  %s831_s10 = sshll.u32 %s1169_s21, 8 }
  0x7b   : > { %843 = vmatpush3.bf16.msra.mxu1 %v952_v4  ;;  %v507_v27 = vsub.s32 0, %v461_v20  ;;  %s643_s9 = sshll.u32 %s384_s24, 4  ;;  %s1413_s25 = scalar_lea.hbm %s1467_s5, %s831_s10  ;;  %s1408_s9 = int_to_ptr.vmem [resolvable:$true] %s643_s9 }
  0x7c   : > { %v459_v19 = vunpack.c.0.s8 %v458_v17  ;;  %v547_v33 = vunpack.c.0.s8 %v546_v24  ;;  %s627_s13 = scalar_lea.sflag [#allocation4], %s1384_s1  ;;  %s1089_s11 = scalar_lea.vmem %s1408_s9, 256 }
  0x7d   : > { %p1090_p4 = scmp.ne.s32.totalorder %s1408_s9, %s1089_s11  ;;  %p1503_p7 = scmp.ne.s32.totalorder %s1490_s14, 0 }
  0x7e   : > { %845 = vmatmul.mubr.msk.bf16.vlgmr.msra.gmra.mxu1 %vm412_vm1, %v394_v7  ;;  %v462_v21 = vsub.s32 %v459_v19, %v461_v20  ;;  %v550_v46 = vsub.s32 %v547_v33, %v461_v20  ;;  %s1193_s21 = smov [#allocation11]  }
  0x7f   : > { %p1091_p9 = pnand %p1090_p4, %p1503_p7  ;;  %s1093_s12 = sshll.u32 %s1193_s21, 4  ;;  %s1094_s12 = int_to_ptr.vmem [resolvable:$false] %s1093_s12 }
  0x80   : > { %s1095_s29 = scalar_lea.vmem %s1094_s12, 512  ;;  %p1096_p0 = scmp.lt.s32.totalorder %s1408_s9, %s1094_s12 }
  0x81   : > { %p1092_p10 = pneg %p1091_p9  ;;  %p1097_p13 = scmp.lt.s32.totalorder %s1095_s29, %s1089_s11 }
  0x83   : > { %p1098_p12 = por %p1097_p13, %p1096_p0 }
  0x85   : > { %p1099_p6 = pnand %p1098_p12, %p1092_p10 }
  0xec   : > { %v401_v10 = vpop.permute.xlu0 %400 }
  0xed   : > { %v405_v11 = vsel %vm402_vm2, %v396_v9, %v401_v10 }
  0xee   : > { %839 = vmatmul.mubr.msk.bf16.vlgmr.msra.gmra.mxu0 %vm412_vm1, %v405_v11 }
 0x13e   : > { %v616_v12 = vpop.f32.mrf.mxu1 }
 0x140   : > { %v846_v13 = vpop.f32.mrf.mxu1 }
 0x142   : > { %v619_v14 = vpop.f32.mrf.mxu1 }
 0x144   : > { %v847_v15 = vpop.f32.mrf.mxu1 }
 0x1ae   : > { %v449_v22 = vpop.f32.mrf.mxu0 }
 0x1af   : > { %v456_v25 = vcombine.high %v449_v22, %v449_v22  ;;  %v463_v26 = vrot.slane %v449_v22, %v462_v21 }
 0x1b0   : > { %v840_v28 = vpop.f32.mrf.mxu0 }
 0x1b1   : > { %v470_v29 = vrot.slane %v456_v25, %v462_v21  ;;  %v471_v30 = vcombine.high %v463_v26, %v463_v26  ;;  %v479_v31 = vrot.slane %v463_v26, %v462_v21 }
 0x1b2   : > { %v452_v32 = vpop.f32.mrf.mxu0 }
 0x1b3   : > { %v472_v34 = vcombine.high %v470_v29, %v470_v29  ;;  %v486_v35 = vrot.slane %v470_v29, %v462_v21  ;;  %v493_v36 = vrot.slane %v471_v30, %v462_v21  ;;  %v501_v37 = vcombine.high %v479_v31, %v479_v31 }
 0x1b4   : > { %v508_v38 = vrot.slane %v479_v31, %v507_v27  ;;  %v841_v39 = vpop.f32.mrf.mxu0 }
 0x1b5   : > { %v500_v40 = vrot.slane %v472_v34, %v462_v21  ;;  %v502_v41 = vcombine.high %v486_v35, %v486_v35  ;;  %v503_v42 = vcombine.high %v493_v36, %v493_v36  ;;  %v512_v43 = vrot.slane %v493_v36, %v507_v27 }
 0x1b6   : > { %v516_v44 = vrot.slane %v501_v37, %v507_v27  ;;  %v524_v45 = vrot.slane %v486_v35, %v507_v27 }
 0x1b7   : > { %v504_v47 = vcombine.high %v500_v40, %v500_v40  ;;  %v520_v48 = vrot.slane %v503_v42, %v507_v27  ;;  %v543_v49 = vcombine.low %v508_v38, %v512_v43  ;;  %v528_v50 = vrot.slane %v500_v40, %v507_v27 }
 0x1b8   : > { %v532_v52 = vrot.slane %v502_v41, %v507_v27 }
 0x1b9   : > { %v544_v51 = vcombine.low %v516_v44, %v520_v48  ;;  %v536_v53 = vrot.slane %v504_v47, %v507_v27  ;;  %v560_v54 = vcombine.low %v524_v45, %v528_v50  ;;  %v551_v55 = vrot.slane %v543_v49, %v550_v46 }
 0x1bb   : > { %v558_v56 = vrot.slane %v544_v51, %v550_v46  ;;  %v561_v57 = vcombine.low %v532_v52, %v536_v53  ;;  %v568_v59 = vrot.slane %v560_v54, %v550_v46 }
 0x1bd   : > { %v559_v58 = vcombine.low %v551_v55, %v558_v56  ;;  %v575_v60 = vrot.slane %v561_v57, %v550_v46 }
 0x1bf   : > { %v617_v61 = vadd.f32 %v616_v12, %v559_v58  ;;  %v576_v62 = vcombine.low %v568_v59, %v575_v60 }
 0x1c1   : > { %624 = vst.msk [vmem:[%s384_s24] sm:$0xff] %vm623_vm3, %v617_v61  ;;  %v620_v63 = vadd.f32 %v619_v14, %v576_v62 }
 0x1c3   : > { %625 = vst.msk [vmem:[%s384_s24 + $0x8] sm:$0xff] %vm623_vm3, %v620_v63 }
 0x1c4   : > { %1102 = shalt.err (!%p1099_p6)
}
 0x1c5   : > { %s1103_s15 = scalar_lea.hbm %s1413_s25, 256  ;;  %s1107_s16 = scalar_lea.hbm %s1467_s5, 512 }
 0x1c6   : > { %p1104_p3 = scmp.ne.s32.totalorder %s1413_s25, %s1103_s15  ;;  %p1108_p11 = scmp.lt.s32.totalorder %s1413_s25, %s1467_s5 }
 0x1c7   : > { %p1109_p1 = scmp.lt.s32.totalorder %s1107_s16, %s1103_s15 }
 0x1c8   : > { %p1105_p2 = pnand %p1104_p3, %p1503_p7 }
 0x1c9   : > { %p1110_p8 = por %p1109_p1, %p1108_p11 }
 0x1ca   : > { %p1106_p5 = pneg %p1105_p2 }
 0x1cc   : > { %p1111_p4 = pnand %p1110_p8, %p1106_p5 }
 0x1ce   : > { %1114 = shalt.err (!%p1111_p4)
}
 0x1cf   : > { %s1194_s27 = smov 128  }
 0x1d0   : > { %862 = dma.vmem_to_hbm [thread:$0]  (%p1503_p7), %s1408_s9, 256, %s1413_s25, %s627_s13, %s1194_s27, %s1194_s27, %s1190_s26  }
 0x1d1 PF: > { %s1504_s28 = sld [smem:[#allocation16_spill]]  ;;  %p1507_p10 = scmp.ge.s32.totalorder %s1177_s23, 2 }
 0x1d2   : > { %s1505_s17 = sld [smem:[#allocation17_spill]] }
 0x1d7   : > { %s658_s6 = sand.u32 1, %s1504_s28  }
 0x1d8   : > { %p1506_p9 = scmp.ne.s32.totalorder %s1505_s17, 0  ;;  %s659_s24 = scalar_lea.sflag [#allocation4], %s658_s6 }
 0x1da   : > { %p882_p0 = pnand %p1507_p10, %p1506_p9 }
 0x1dc   : > { %p883_p13 = pneg %p882_p0 }
 0x1de   : > { %1152 = dma.done.wait (%p883_p13), %s659_s24, 256  }
 0x1df   : > { %1154 = vsyncadd (%p883_p13), %s659_s24, 4294967040  ;;  %s25_s23 = sadd.s32 1, %s1177_s23   ;;  %s1508_s14 = sld [smem:[#allocation19_spill]] }
 0x1e0   : > { %p22_p12 = scmp.ge.s32.totalorder %s25_s23, 4   ;;  %s1509_s1 = sld [smem:[#allocation18_spill]] }
 0x1e1   : > { %s1510_s18 = smov %s1161_s19  ;;  %s1511_s19 = smov %s1165_s20 }
 0x1e2   : > { %s1513_s21 = smov %s1173_s22  ;;  %24 = sbr.rel (!%p22_p12) target bundleno = 13 (0xd), region = 117 }
 0x1e5   : > { %s1512_s20 = smov %s1508_s14 }
 0x1e6   : > { %s1514_s22 = smov %s1509_s1 }
 0x1e7   :  { %664 = vsyncpa [#allocation3], 1 }
 0x1e8   :  { %666 = vsyncpa [#allocation3 + $0x1], 1 }
 0x1e9   :  { %667 = vsyncpa [#allocation6], 1 }
 0x1ea   :  { %669 = vsyncpa [#allocation6 + $0x1], 1 }
 0x1eb   :  { %670 = vsyncpa [#allocation9], 1 }
 0x1ec   :  { %671 = vsyncpa [#allocation4], 1 }
 0x1ed   :  { %673 = vsyncpa [#allocation4 + $0x1], 1 }

</bundles_post_ra>
